<compile_context>
chip_gen: v7x
topology: tpu7x:2x2x1
jax: 0.10.0
libtpu: 0.0.40
codegen_flags: <defaults>
</compile_context>

<pallas_src>
import jax
import jax.numpy as jnp
from jax.experimental import pallas as pl
from jax.experimental.pallas import tpu as pltpu

LANE = 128            # vreg lane width
SUBLANE = 8           # f32 sublane tile
MAX_TILE_ROWS = 4096  # (4096, 128) f32 block = 2 MiB per pipeline buffer


def qnet_kernel(p_ref, x_ref, o_ref):
    # p_ref: (7,) f32 in SMEM = [w1_0, w1_1, b1_0, b1_1, w2_0, w2_1, b2]
    # x_ref/o_ref: (tile_rows, 128) lane-dense slabs of the flattened batch.
    x = x_ref[...]
    w1_0 = p_ref[0]
    w1_1 = p_ref[1]
    b1_0 = p_ref[2]
    b1_1 = p_ref[3]
    w2_0 = p_ref[4]
    w2_1 = p_ref[5]
    b2 = p_ref[6]

    # fc1 + ReLU, hidden dim of 2 unrolled (stays entirely in VALU slots).
    h0 = jnp.maximum(x * w1_0 + b1_0, 0.0)
    h1 = jnp.maximum(x * w1_1 + b1_1, 0.0)

    # fc2: scalar-broadcast multiplies, single fused lane-dense store.
    o_ref[...] = (h0 * w2_0 + h1 * w2_1 + b2).astype(o_ref.dtype)


def _dimension_semantics(num_steps):
    # v7x has 2 TensorCores sharing HBM; split the grid across them when there
    # is actual work to split. On v5e/v6e (1 TC) this returns plain "parallel".
    kind = jax.devices()[0].device_kind.lower()
    if num_steps >= 2 and "v7" in kind:
        return (pltpu.CORE_PARALLEL,)
    return ("parallel",)


def qnet_forward(x, params):
    """x: (B, 1) f32, params: (7,) f32. Returns (B, 1) f32."""
    B = x.shape[0]
    if B == 0:
        return jnp.zeros((0, 1), jnp.float32)

    tile_elems = SUBLANE * LANE  # 1024
    fast_path = (B % tile_elems) == 0
    if fast_path:
        # Contiguous reshape only: no padded copy, no output slice copy.
        rows = B // LANE
        x_flat = x.reshape(rows, LANE)
    else:
        # Pad only to one sublane tile (<= 1023 extra elements), NOT to a whole
        # pipeline block; padded tail rows are sliced off below so the nonzero
        # relu(b1)*w2 + b2 they compute is never observed.
        rows = pl.cdiv(B, tile_elems) * SUBLANE
        x_flat = jnp.pad(x.reshape(-1), (0, rows * LANE - B)).reshape(rows, LANE)
        # TODO(synk): the general-B path still pays ~2 extra HBM passes for the
        # pad and slice; a manual memory_space=pl.ANY + masked-tail-DMA path
        # (or verified allow_input_fusion) would remove them.

    tile_rows = min(MAX_TILE_ROWS, rows)          # multiple of 8 by construction
    num_steps = pl.cdiv(rows, tile_rows)          # partial last block is masked

    n_elems = rows * LANE
    cost = pl.CostEstimate(
        flops=10 * n_elems,                       # ~10 VPU flops / element
        transcendentals=0,
        bytes_accessed=2 * n_elems * 4,           # read x + write out, f32
    )

    out = pl.pallas_call(
        qnet_kernel,
        out_shape=jax.ShapeDtypeStruct((rows, LANE), jnp.float32),
        grid=(num_steps,),
        in_specs=[
            # all 7 scalars in one SMEM array (no per-param (8,128) VMEM tiles)
            pl.BlockSpec(memory_space=pltpu.MemorySpace.SMEM),
            # lane-dense batch slab, double-buffered by the Pallas pipeline
            pl.BlockSpec((tile_rows, LANE), lambda i: (i, 0)),
        ],
        out_specs=pl.BlockSpec((tile_rows, LANE), lambda i: (i, 0)),
        compiler_params=pltpu.CompilerParams(
            dimension_semantics=_dimension_semantics(num_steps),
            vmem_limit_bytes=32 << 20,            # 8 MiB used; safe on v7x too
        ),
        cost_estimate=cost,
    )(params, x_flat)

    if fast_path:
        return out.reshape(B, 1)                  # free reshape
    return out.reshape(-1)[:B].reshape(B, 1)


def init_params(key):
    # PyTorch nn.Linear default init: U(-1/sqrt(fan_in), 1/sqrt(fan_in)),
    # weights stored in PyTorch (out_features, in_features) layout.
    k1, k2, k3, k4 = jax.random.split(key, 4)
    bound1 = 1.0                      # fc1: fan_in = 1
    bound2 = 1.0 / jnp.sqrt(2.0)      # fc2: fan_in = 2
    w1 = jax.random.uniform(k1, (2, 1), jnp.float32, -bound1, bound1)
    b1 = jax.random.uniform(k2, (2,), jnp.float32, -bound1, bound1)
    w2 = jax.random.uniform(k3, (1, 2), jnp.float32, -bound2, bound2)
    b2 = jax.random.uniform(k4, (1,), jnp.float32, -bound2, bound2)
    return w1, b1, w2, b2


def pack_params(w1, b1, w2, b2):
    # [w1_0, w1_1, b1_0, b1_1, w2_0, w2_1, b2]
    return jnp.concatenate(
        [w1.reshape(-1), b1.reshape(-1), w2.reshape(-1), b2.reshape(-1)]
    ).astype(jnp.float32)


def qnet_reference(x, w1, b1, w2, b2):
    h = jnp.maximum(x @ w1.T + b1, 0.0)
    return h @ w2.T + b2


if __name__ == "__main__":
    key = jax.random.PRNGKey(0)
    k_param, k_x = jax.random.split(key)
    w1, b1, w2, b2 = init_params(k_param)
    params = pack_params(w1, b1, w2, b2)

    # Small deterministic shapes: B=2/8/1000 exercise the padded path,
    # B=1024 exercises the zero-copy fast path (multiple of SUBLANE*LANE).
    for B in (2, 8, 1000, 1024):
        kx = jax.random.fold_in(k_x, B)
        x = jax.random.normal(kx, (B, 1), jnp.float32)

        out = qnet_forward(x, params)
        jax.block_until_ready(out)

        ref = qnet_reference(x, w1, b1, w2, b2)
        assert out.shape == (B, 1)
        assert jnp.allclose(out, ref, atol=1e-5, rtol=1e-5)

    print("KERNEL_OK")
</pallas_src>

<mosaic_0001>
module attributes {stable_mosaic.version = 11 : i64} {
  func.func @qnet_kernel(%arg0: i32, %arg1: memref<7xf32, #tpu.memory_space<smem>>, %arg2: memref<8x128xf32, #tpu.memory_space<vmem>>, %arg3: memref<8x128xf32, #tpu.memory_space<vmem>>) attributes {dimension_semantics = [#tpu.dimension_semantics<parallel>], iteration_bounds = array<i64: 1>, scalar_prefetch = 0 : i64, scratch_operands = 0 : i64, tpu.core_type = #tpu.core_type<tc>, window_params = [{transform_indices = @transform_0, window_bounds = array<i64: 7>}, {transform_indices = @transform_1, window_bounds = array<i64: 8, 128>}, {transform_indices = @transform_2, window_bounds = array<i64: 8, 128>}]} {
    %c0 = arith.constant 0 : index
    %c0_0 = arith.constant 0 : index
    %0 = vector.load %arg2[%c0, %c0_0] : memref<8x128xf32, #tpu.memory_space<vmem>>, vector<8x128xf32>
    %c0_1 = arith.constant 0 : index
    %1 = memref.load %arg1[%c0_1] : memref<7xf32, #tpu.memory_space<smem>>
    %c1 = arith.constant 1 : index
    %2 = memref.load %arg1[%c1] : memref<7xf32, #tpu.memory_space<smem>>
    %c2 = arith.constant 2 : index
    %3 = memref.load %arg1[%c2] : memref<7xf32, #tpu.memory_space<smem>>
    %c3 = arith.constant 3 : index
    %4 = memref.load %arg1[%c3] : memref<7xf32, #tpu.memory_space<smem>>
    %c4 = arith.constant 4 : index
    %5 = memref.load %arg1[%c4] : memref<7xf32, #tpu.memory_space<smem>>
    %c5 = arith.constant 5 : index
    %6 = memref.load %arg1[%c5] : memref<7xf32, #tpu.memory_space<smem>>
    %c6 = arith.constant 6 : index
    %7 = memref.load %arg1[%c6] : memref<7xf32, #tpu.memory_space<smem>>
    %8 = vector.broadcast %1 : f32 to vector<8x128xf32>
    %9 = arith.mulf %0, %8 : vector<8x128xf32>
    %10 = vector.broadcast %3 : f32 to vector<8x128xf32>
    %11 = arith.addf %9, %10 : vector<8x128xf32>
    %cst = arith.constant 0.000000e+00 : f32
    %12 = vector.broadcast %cst : f32 to vector<8x128xf32>
    %13 = arith.maximumf %11, %12 : vector<8x128xf32>
    %14 = vector.broadcast %2 : f32 to vector<8x128xf32>
    %15 = arith.mulf %0, %14 : vector<8x128xf32>
    %16 = vector.broadcast %4 : f32 to vector<8x128xf32>
    %17 = arith.addf %15, %16 : vector<8x128xf32>
    %cst_2 = arith.constant 0.000000e+00 : f32
    %18 = vector.broadcast %cst_2 : f32 to vector<8x128xf32>
    %19 = arith.maximumf %17, %18 : vector<8x128xf32>
    %20 = vector.broadcast %5 : f32 to vector<8x128xf32>
    %21 = arith.mulf %13, %20 : vector<8x128xf32>
    %22 = vector.broadcast %6 : f32 to vector<8x128xf32>
    %23 = arith.mulf %19, %22 : vector<8x128xf32>
    %24 = arith.addf %21, %23 : vector<8x128xf32>
    %25 = vector.broadcast %7 : f32 to vector<8x128xf32>
    %26 = arith.addf %24, %25 : vector<8x128xf32>
    %c0_3 = arith.constant 0 : index
    %c0_4 = arith.constant 0 : index
    %27 = vector.load %arg3[%c0_3, %c0_4] : memref<8x128xf32, #tpu.memory_space<vmem>>, vector<8x128xf32>
    tpu.vector_store %arg3[%c0_3, %c0_4], %26 {strides = array<i32>} : memref<8x128xf32, #tpu.memory_space<vmem>>, vector<8x128xf32>,
    return
  }
  func.func @transform_0(%arg0: i32) -> i32 {
    %c0_i32 = arith.constant 0 : i32
    %c0_i32_0 = arith.constant 0 : i32
    return %c0_i32 : i32
  }
  func.func @transform_1(%arg0: i32) -> (i32, i32) {
    %c0_i32 = arith.constant 0 : i32
    %c0_i32_0 = arith.constant 0 : i32
    return %arg0, %c0_i32 : i32, i32
  }
  func.func @transform_2(%arg0: i32) -> (i32, i32) {
    %c0_i32 = arith.constant 0 : i32
    %c0_i32_0 = arith.constant 0 : i32
    return %arg0, %c0_i32 : i32, i32
  }
}

</mosaic_0001>

<bundles_post_ra>
// kernel: tpu_custom_call.1
= control target key start
LH: loop header
LB: loop body
LE: loop exit
PB: predicated region body
PF: predicated region fallthrough
CT: control target
= control target key end

     0   :  { %7 = vsyncpa [#allocation5], 0  ;;  %s200_s0 = inlined_call_operand.hbm [shape: f32[7], index: 0, kind: input, shape index: {}]   ;;  %s201_s1 = inlined_call_operand.hbm [shape: f32[8,128], index: 1, kind: input, shape index: {}]   ;;  %s202_s2 = inlined_call_operand.hbm [shape: f32[8,128], index: 2, kind: output, shape index: {}]  }
   0x1   :  { %8 = vsyncpa [#allocation3], 0 }
   0x2   :  { %9 = vsyncpa [#allocation4], 0  ;;  %s86_s11 = scalar_lea.hbm %s200_s0, 16 }
   0x3   :  { %p87_p0 = scmp.ne.s32.totalorder %s200_s0, %s86_s11  ;;  %p90_p1 = scmp.lt.u32.totalorder %s86_s11, %s200_s0 }
   0x5   :  { %p92_p2 = pnand %p90_p1, %p87_p0 }
   0x7   :  { %95 = shalt.err (!%p92_p2)
}
   0x8   :  { %s146_s16 = smov [#allocation2]   ;;  %s147_s19 = smov [#allocation6]  }
   0x9   :  { %17 = dma.hbm_to_smem %s200_s0, 16, %s146_s16, [#allocation5]  }
   0xa   :  { %s24_s20 = sshll.u32 %s147_s19, 4  ;;  %s96_s23 = scalar_lea.hbm %s201_s1, 128  ;;  %s25_s20 = int_to_ptr.vmem [resolvable:$true] %s24_s20 }
   0xb   :  { %p97_p3 = scmp.ne.s32.totalorder %s201_s1, %s96_s23  ;;  %p100_p4 = scmp.lt.u32.totalorder %s96_s23, %s201_s1 }
   0xd   :  { %p102_p5 = pnand %p100_p4, %p97_p3 }
   0xf   :  { %105 = shalt.err (!%p102_p5)
}
  0x10   :  { %s106_s28 = scalar_lea.vmem %s25_s20, 128  ;;  %p111_p7 = scmp.lt.s32.totalorder %s25_s20, %s25_s20 }
  0x11   :  { %p107_p6 = scmp.ne.s32.totalorder %s25_s20, %s106_s28  ;;  %p112_p8 = scmp.lt.s32.totalorder %s106_s28, %s106_s28 }
  0x13   :  { %p113_p9 = por %p112_p8, %p111_p7 }
  0x15   :  { %p114_p10 = pnand %p113_p9, %p107_p6 }
  0x17   :  { %117 = shalt.err (!%p114_p10)
}
  0x18   :  { %27 = dma.hbm_to_vmem [thread:$0]  %s201_s1, 128, %s25_s20, [#allocation3]  }
  0x19   :  { %140 = dma.done.wait [#allocation5], 16  }
  0x1a   :  { %141 = vsyncadd [#allocation5], 4294967280 }
  0x1b   :  { %142 = dma.done.wait [#allocation3], 128  }
  0x1c   :  { %143 = vsyncadd [#allocation3], 4294967168 }
  0x1d   :  { %34 = sfence }
  0x1e   :  { %s36_s30 = sld [smem:[#allocation2]]  ;;  %s77_s3 = sld [smem:[#allocation2 + $0x1]]  ;;  %v35_v0 = vld [vmem:[#allocation6] sm:$0xff] }
  0x1f   :  { %s78_s4 = sld [smem:[#allocation2 + $0x2]]  ;;  %s79_s5 = sld [smem:[#allocation2 + $0x3]] }
  0x20   :  { %s80_s6 = sld [smem:[#allocation2 + $0x4]]  ;;  %s81_s7 = sld [smem:[#allocation2 + $0x5]] }
  0x21   :  { %s82_s8 = sld [smem:[#allocation2 + $0x6]]  ;;  %s148_s1 = smov [#allocation7]  }
  0x22   :  { %s67_s9 = sshll.u32 %s148_s1, 4  ;;  %s68_s9 = int_to_ptr.vmem [resolvable:$true] %s67_s9 }
  0x23   :  { %s118_s10 = scalar_lea.vmem %s68_s9, 128  ;;  %p123_p12 = scmp.lt.s32.totalorder %s68_s9, %s68_s9 }
  0x24   :  { %v43_v1 = vstv %s36_s30  ;;  %v48_v2 = vstv %s77_s3  ;;  %p119_p11 = scmp.ne.s32.totalorder %s68_s9, %s118_s10  ;;  %p124_p13 = scmp.lt.s32.totalorder %s118_s10, %s118_s10 }
  0x25   :  { %v44_v3 = vmul.f32 %v43_v1, %v35_v0  ;;  %v45_v4 = vstv %s78_s4  ;;  %v49_v5 = vmul.f32 %v48_v2, %v35_v0  ;;  %v50_v6 = vstv %s79_s5 }
  0x26   :  { %v53_v9 = vstv %s80_s6  ;;  %v55_v10 = vstv %s81_s7  ;;  %p125_p0 = por %p124_p13, %p123_p12 }
  0x27   :  { %v46_v7 = vadd.f32 %v45_v4, %v44_v3  ;;  %v51_v8 = vadd.f32 %v50_v6, %v49_v5  ;;  %v58_v15 = vstv %s82_s8 }
  0x28   :  { %p126_p1 = pnand %p125_p0, %p119_p11 }
  0x29   :  { %v47_v11 = vmax.f32 %v46_v7, 0.0  ;;  %v52_v12 = vmax.f32 %v51_v8, 0.0 }
  0x2b   :  { %v54_v13 = vmul.f32 %v53_v9, %v47_v11  ;;  %v56_v14 = vmul.f32 %v55_v10, %v52_v12 }
  0x2d   :  { %v57_v16 = vadd.f32 %v56_v14, %v54_v13 }
  0x2f   :  { %v59_v17 = vadd.f32 %v58_v15, %v57_v16 }
  0x31   :  { %60 = vst [vmem:[#allocation7] sm:$0xff] %v59_v17 }
  0x32   :  { %129 = shalt.err (!%p126_p1)
}
  0x33   :  { %s130_s13 = scalar_lea.hbm %s202_s2, 128 }
  0x34   :  { %p131_p2 = scmp.ne.s32.totalorder %s202_s2, %s130_s13  ;;  %p134_p3 = scmp.lt.u32.totalorder %s130_s13, %s202_s2 }
  0x36   :  { %p136_p4 = pnand %p134_p3, %p131_p2 }
  0x38   :  { %139 = shalt.err (!%p136_p4)
}
  0x39   :  { %70 = dma.vmem_to_hbm [thread:$0]  %s68_s9, 128, %s202_s2, [#allocation4]  }
  0x3a   :  { %144 = dma.done.wait [#allocation4], 128  }
  0x3b   :  { %145 = vsyncadd [#allocation4], 4294967168 }
  0x3c   :  { %74 = vsyncpa [#allocation3], 1 }
  0x3d   :  { %75 = vsyncpa [#allocation4], 1 }
  0x3e   :  { %76 = vsyncpa [#allocation5], 1 }

</bundles_post_ra>
